<compile_context>
chip_gen: v7x
topology: tpu7x:2x2x1
jax: 0.10.0
libtpu: 0.0.40
codegen_flags: <defaults>
</compile_context>

<pallas_src>
import jax
import jax.numpy as jnp
from jax.experimental import pallas as pl
from jax.experimental.pallas import tpu as pltpu

BN_EPS = 1e-5
OUT_PAD = 128                     # lane-dense output slab width
_SINGLE_BLOCK_MAX_B = 64          # above this, force >= 2 grid blocks (v7x: 2 TCs)
_VMEM_BUDGET = 24 * 1024 * 1024   # conservative working-set budget (fits v7x's 64 MiB)


def _round8(n):
    return ((n + 7) // 8) * 8


def _make_kernel(hidden, h2):
    def kernel(x_ref, w1_ref, pk_ref, o_ref):
        # Linear-1: BN and the spatial mean-pool are already folded into
        # w1'/b1' on the host. bf16 operands feed the MXU; f32 accumulation.
        xb = x_ref[...].astype(jnp.bfloat16)
        h = jnp.dot(xb, w1_ref[...], preferred_element_type=jnp.float32)   # (tb, hidden)

        tail = pk_ref[h2:h2 + 8, :]          # (8, 128) aligned sublane slice
        b1 = tail[0:1, :hidden]              # BN-folded Linear-1 bias
        b2 = tail[1:2, :]                    # Linear-2 bias (zero-padded lanes)

        h = jnp.maximum(h + b1, 0.0)         # bias + ReLU (BN already folded)
        # Dropout(p): identity in eval mode.
        # TODO(synk): training-mode dropout (random mask + 1/(1-p) scale) not emitted.

        w2 = pk_ref[0:hidden, :]             # (hidden, 128), zero-padded lanes
        out = jnp.dot(h, w2, preferred_element_type=jnp.float32) + b2
        o_ref[...] = out.astype(o_ref.dtype)  # lane-dense (tb, 128) bf16 store
    return kernel


def make_params(key, in_features, hidden_dim=32, out_dim=2):
    k1, k2, k3, k4, k5, k6, k7, k8 = jax.random.split(key, 8)
    # Linear weights stored already transposed for (x @ W).
    w1 = jax.random.normal(k1, (in_features, hidden_dim), jnp.float32) * 0.1
    b1 = jax.random.normal(k2, (1, hidden_dim), jnp.float32) * 0.1
    gamma = 1.0 + 0.1 * jax.random.normal(k3, (1, hidden_dim), jnp.float32)
    beta = 0.1 * jax.random.normal(k4, (1, hidden_dim), jnp.float32)
    running_mean = 0.1 * jax.random.normal(k5, (1, hidden_dim), jnp.float32)
    running_var = 1.0 + 0.1 * jax.random.uniform(k6, (1, hidden_dim), jnp.float32)
    w2 = jax.random.normal(k7, (hidden_dim, out_dim), jnp.float32) * 0.1
    b2 = jax.random.normal(k8, (1, out_dim), jnp.float32) * 0.1
    return dict(w1=w1, b1=b1, gamma=gamma, beta=beta,
                rm=running_mean, rv=running_var, w2=w2, b2=b2)


def fold_mlp_head_params(params, hw):
    """Fold eval-mode BN + spatial mean-pool into Linear-1 and pack the small
    params. Call ONCE per parameter set / spatial size (hoisted out of the
    per-forward path)."""
    hidden = params["w1"].shape[1]
    out_dim = params["w2"].shape[1]
    assert out_dim <= OUT_PAD
    h2 = _round8(hidden)

    # Eval-mode BN fold (done in f32 on the host).
    scale = params["gamma"] * jax.lax.rsqrt(params["rv"] + BN_EPS)      # (1, hidden)
    w1_bn = params["w1"] * scale                                        # (C, hidden)
    b1_bn = (params["b1"] - params["rm"]) * scale + params["beta"]      # (1, hidden)

    # Fold the spatial mean-pool: pooled @ w1 == x_flat @ (repeat(w1, HW)/HW).
    # TODO(synk): for very large C*HW (big backbone feature maps on v7x) switch
    # to an in-kernel spatial reduce / K-tiled reduction instead of this repeat.
    if hw > 1:
        w1f = jnp.repeat(w1_bn, hw, axis=0) * (1.0 / hw)                # (C*HW, hidden)
    else:
        w1f = w1_bn                                                     # 2D path: no-op
    w1f = w1f.astype(jnp.bfloat16)     # halve resident/streamed weight footprint

    # Pack w2, b1', b2 into one lane-dense array (rows 8-aligned).
    packed = jnp.zeros((h2 + 8, OUT_PAD), jnp.float32)
    packed = packed.at[:hidden, :out_dim].set(params["w2"])
    packed = packed.at[h2, :hidden].set(b1_bn[0])
    packed = packed.at[h2 + 1, :out_dim].set(params["b2"][0])
    return dict(w1f=w1f, packed=packed, hidden=hidden, h2=h2,
                out_dim=out_dim, hw=hw)


def _vmem_bytes(tb, K, x_bytes, hidden, h2):
    return (2 * tb * K * x_bytes            # double-buffered x tiles
            + 2 * K * hidden * 2            # w1' (bf16), constant-index block
            + 2 * (h2 + 8) * OUT_PAD * 4    # packed small params
            + 2 * tb * OUT_PAD * 2)         # bf16 output slab


def mlp_head(x, folded, *, block_b=512):
    """Forward pass of MLPHead. Accepts (B, C, H, W) or (B, C)."""
    hw = folded["hw"]
    if x.ndim == 4:
        B, C, H, W = x.shape
        if H * W != hw:
            raise ValueError("folded params were prepared for a different H*W")
        x2 = x.reshape(B, C * hw)
    elif x.ndim == 2:
        if hw != 1:
            raise ValueError("folded params were prepared for 4D input (hw > 1)")
        B = x.shape[0]
        x2 = x
    else:
        raise ValueError("MLPHead expects 2D or 4D input")

    K = x2.shape[1]
    if K != folded["w1f"].shape[0]:
        raise ValueError("input feature size does not match folded params")
    hidden, h2, out_dim = folded["hidden"], folded["h2"], folded["out_dim"]
    x_bytes = x2.dtype.itemsize

    # --- batch tile selection (multiple of 8, VMEM-budgeted) -----------------
    tb = max(8, _round8(block_b))
    while tb > 8 and _vmem_bytes(tb, K, x_bytes, hidden, h2) > _VMEM_BUDGET:
        tb = max(8, _round8(tb // 2))

    if B <= _SINGLE_BLOCK_MAX_B:
        tb = B                        # single full-array block (always legal)
        grid_b = 1
    else:
        # At least 2 blocks so v7x's two TensorCores both get work.
        tb = max(8, min(tb, _round8(pl.cdiv(B, 2))))
        grid_b = pl.cdiv(B, tb)       # ragged last block; no host-side padding

    vmem_limit = int(min(max(2 * _vmem_bytes(tb, K, x_bytes, hidden, h2) + (4 << 20),
                             32 << 20), 48 << 20))

    kernel = _make_kernel(hidden, h2)
    out = pl.pallas_call(
        kernel,
        out_shape=jax.ShapeDtypeStruct((B, OUT_PAD), jnp.bfloat16),
        grid=(grid_b,),
        in_specs=[
            pl.BlockSpec((tb, K), lambda i: (i, 0)),             # x tile (streamed)
            # Constant-index weight blocks (resident across the grid). At these
            # sizes the redundant second pipeline buffer is negligible; for
            # large K prefer pipeline_mode=pl.Buffered(1) / a K reduction axis.
            pl.BlockSpec((K, hidden), lambda i: (0, 0)),         # w1' (bf16)
            pl.BlockSpec((h2 + 8, OUT_PAD), lambda i: (0, 0)),   # packed b1'/w2/b2
        ],
        out_specs=pl.BlockSpec((tb, OUT_PAD), lambda i: (i, 0)),
        compiler_params=pltpu.CompilerParams(
            dimension_semantics=("parallel",),
            vmem_limit_bytes=vmem_limit),
    )(x2, folded["w1f"], folded["packed"])

    return out[:, :out_dim].astype(jnp.float32)


def mlp_head_ref(x, params):
    """Pure-JAX f32 reference for a sanity check."""
    if x.ndim == 4:
        x = jnp.mean(x, axis=(2, 3))
    h = x @ params["w1"] + params["b1"]
    h = (h - params["rm"]) * jax.lax.rsqrt(params["rv"] + BN_EPS) * params["gamma"] + params["beta"]
    h = jnp.maximum(h, 0.0)
    return h @ params["w2"] + params["b2"]


if __name__ == "__main__":
    key = jax.random.PRNGKey(0)
    kx, kp, kg = jax.random.split(key, 3)

    B, C, H, W = 2, 4, 16, 16          # in_features = C after global pooling
    hidden_dim, out_dim = 32, 2

    params = make_params(kp, in_features=C, hidden_dim=hidden_dim, out_dim=out_dim)

    # Fold once per (params, spatial size) -- hoisted out of the per-call path.
    folded_4d = fold_mlp_head_params(params, hw=H * W)
    folded_2d = fold_mlp_head_params(params, hw=1)

    # bf16 MXU streaming + bf16 writeback: modest tolerance vs the f32 reference.
    TOL = dict(atol=5e-3, rtol=5e-3)

    # 4D path, small batch (single full block).
    x = jax.random.normal(kx, (B, C, H, W), jnp.float32)
    out = jax.block_until_ready(mlp_head(x, folded_4d))
    ref = mlp_head_ref(x, params)
    assert out.shape == (B, out_dim)
    assert jnp.allclose(out, ref, **TOL), \
        f"4D path mismatch, max abs err = {jnp.max(jnp.abs(out - ref))}"

    # 2D path (already-flat features, like FGINet's concatenated pooled feat).
    x2d = jax.random.normal(kx, (B, C), jnp.float32)
    out2d = jax.block_until_ready(mlp_head(x2d, folded_2d))
    assert jnp.allclose(out2d, mlp_head_ref(x2d, params), **TOL)

    # Gridded ragged-batch path: no host-side padding, >= 2 parallel blocks.
    xg = jax.random.normal(kg, (70, C, H, W), jnp.float32)
    outg = jax.block_until_ready(mlp_head(xg, folded_4d, block_b=16))
    refg = mlp_head_ref(xg, params)
    assert outg.shape == (70, out_dim)
    assert jnp.allclose(outg, refg, **TOL), \
        f"gridded path mismatch, max abs err = {jnp.max(jnp.abs(outg - refg))}"

    print("KERNEL_OK")
</pallas_src>

<mosaic_0001>
module attributes {stable_mosaic.version = 11 : i64} {
  func.func @kernel(%arg0: i32, %arg1: memref<2x1024xf32, #tpu.memory_space<vmem>>, %arg2: memref<1024x32xbf16, #tpu.memory_space<vmem>>, %arg3: memref<40x128xf32, #tpu.memory_space<vmem>>, %arg4: memref<2x128xbf16, #tpu.memory_space<vmem>>) attributes {dimension_semantics = [#tpu.dimension_semantics<parallel>], iteration_bounds = array<i64: 1>, scalar_prefetch = 0 : i64, scratch_operands = 0 : i64, tpu.core_type = #tpu.core_type<tc>, window_params = [{transform_indices = @transform_0, window_bounds = array<i64: 2, 1024>}, {pipeline_mode = #tpu.pipeline_mode<synchronous>, transform_indices = @transform_1, window_bounds = array<i64: 1024, 32>}, {pipeline_mode = #tpu.pipeline_mode<synchronous>, transform_indices = @transform_2, window_bounds = array<i64: 40, 128>}, {transform_indices = @transform_3, window_bounds = array<i64: 2, 128>}]} {
    %c0 = arith.constant 0 : index
    %c0_0 = arith.constant 0 : index
    %0 = vector.load %arg1[%c0, %c0_0] : memref<2x1024xf32, #tpu.memory_space<vmem>>, vector<2x1024xf32>
    %1 = arith.truncf %0 : vector<2x1024xf32> to vector<2x1024xbf16>
    %c0_1 = arith.constant 0 : index
    %c0_2 = arith.constant 0 : index
    %2 = vector.load %arg2[%c0_1, %c0_2] : memref<1024x32xbf16, #tpu.memory_space<vmem>>, vector<1024x32xbf16>
    %cst = arith.constant dense<0.000000e+00> : vector<2x32xf32>
    %3 = tpu.matmul %1, %2, %cst {dimension_numbers = #tpu.dot_dimension_numbers<[1], [0], [0], [1], [0, 0, 1, 1], [], []>} : vector<2x1024xbf16>, vector<1024x32xbf16>, vector<2x32xf32> -> vector<2x32xf32>
    %c32 = arith.constant 32 : index
    %c0_3 = arith.constant 0 : index
    %4 = vector.load %arg3[%c32, %c0_3] : memref<40x128xf32, #tpu.memory_space<vmem>>, vector<8x128xf32>
    %5 = vector.extract_strided_slice %4 {offsets = [0, 0], sizes = [1, 32], strides = [1, 1]} : vector<8x128xf32> to vector<1x32xf32>
    %6 = vector.extract_strided_slice %4 {offsets = [1, 0], sizes = [1, 128], strides = [1, 1]} : vector<8x128xf32> to vector<1x128xf32>
    %7 = vector.broadcast %5 : vector<1x32xf32> to vector<2x32xf32>
    %8 = arith.addf %3, %7 : vector<2x32xf32>
    %cst_4 = arith.constant 0.000000e+00 : f32
    %9 = vector.broadcast %cst_4 : f32 to vector<2x32xf32>
    %10 = arith.maximumf %8, %9 : vector<2x32xf32>
    %c0_5 = arith.constant 0 : index
    %c0_6 = arith.constant 0 : index
    %11 = vector.load %arg3[%c0_5, %c0_6] : memref<40x128xf32, #tpu.memory_space<vmem>>, vector<32x128xf32>
    %cst_7 = arith.constant dense<0.000000e+00> : vector<2x128xf32>
    %12 = tpu.matmul %10, %11, %cst_7 {dimension_numbers = #tpu.dot_dimension_numbers<[1], [0], [0], [1], [0, 0, 1, 1], [], []>} : vector<2x32xf32>, vector<32x128xf32>, vector<2x128xf32> -> vector<2x128xf32>
    %13 = vector.broadcast %6 : vector<1x128xf32> to vector<2x128xf32>
    %14 = arith.addf %12, %13 : vector<2x128xf32>
    %15 = arith.truncf %14 : vector<2x128xf32> to vector<2x128xbf16>
    %c0_8 = arith.constant 0 : index
    %c0_9 = arith.constant 0 : index
    %16 = vector.load %arg4[%c0_8, %c0_9] : memref<2x128xbf16, #tpu.memory_space<vmem>>, vector<2x128xbf16>
    tpu.vector_store %arg4[%c0_8, %c0_9], %15 {strides = array<i32>} : memref<2x128xbf16, #tpu.memory_space<vmem>>, vector<2x128xbf16>,
    return
  }
  func.func @transform_0(%arg0: i32) -> (i32, i32) {
    %c0_i32 = arith.constant 0 : i32
    %c0_i32_0 = arith.constant 0 : i32
    return %arg0, %c0_i32 : i32, i32
  }
  func.func @transform_1(%arg0: i32) -> (i32, i32) {
    %c0_i32 = arith.constant 0 : i32
    %c0_i32_0 = arith.constant 0 : i32
    %c0_i32_1 = arith.constant 0 : i32
    return %c0_i32, %c0_i32_0 : i32, i32
  }
  func.func @transform_2(%arg0: i32) -> (i32, i32) {
    %c0_i32 = arith.constant 0 : i32
    %c0_i32_0 = arith.constant 0 : i32
    %c0_i32_1 = arith.constant 0 : i32
    return %c0_i32, %c0_i32_0 : i32, i32
  }
  func.func @transform_3(%arg0: i32) -> (i32, i32) {
    %c0_i32 = arith.constant 0 : i32
    %c0_i32_0 = arith.constant 0 : i32
    return %arg0, %c0_i32 : i32, i32
  }
}

</mosaic_0001>

<bundles_post_ra>
// kernel: tpu_custom_call.1
= control target key start
LH: loop header
LB: loop body
LE: loop exit
PB: predicated region body
PF: predicated region fallthrough
CT: control target
= control target key end

     0   :  { %v24_v28 = vlaneseq  ;;  %v1116_v36 = vmov 1983009808   ;;  %s1377_s0 = inlined_call_operand.vmem [shape: f32[2,1024], index: 0, kind: input, shape index: {}]   ;;  %s1378_s1 = inlined_call_operand.vmem [shape: bf16[1024,32], index: 1, kind: input, shape index: {}]   ;;  %s1379_s2 = inlined_call_operand.vmem [shape: f32[40,128], index: 2, kind: input, shape index: {}]   ;;  %s1380_s3 = inlined_call_operand.hbm [shape: bf16[2,128], index: 3, kind: output, shape index: {}]  }
   0x1   :  { %v1026_v0 = vld [vmem:[%s1378_s1 + $0x40] sm:$0xff]   ;;  %v1030_v4 = vld [vmem:[%s1378_s1 + $0x48] sm:$0xff]   ;;  %v1034_v8 = vld [vmem:[%s1378_s1 + $0x50] sm:$0xff]   ;;  %v22_v37 = vunpack.c.l.s4 %v1116_v36 }
   0x2   :  { %v1027_v1 = vld [vmem:[%s1378_s1 + $0xc0] sm:$0xff]   ;;  %911 = vmatprep.subr.bf16.mxu0 %v1026_v0  ;;  %v1031_v5 = vld [vmem:[%s1378_s1 + $0xc8] sm:$0xff]   ;;  %v1035_v9 = vld [vmem:[%s1378_s1 + $0xd0] sm:$0xff]   ;;  %v1237_v33 = vshrl.u32 %v24_v28, 7 }
   0x3   :  { %v1028_v2 = vld [vmem:[%s1378_s1] sm:$0xff]   ;;  %933 = vmatprep.subr.bf16.mxu1 %v1027_v1  ;;  %v1032_v6 = vld [vmem:[%s1378_s1 + $0x8] sm:$0xff]   ;;  %v1036_v10 = vld [vmem:[%s1378_s1 + $0x10] sm:$0xff]   ;;  %v23_v39 = vunpack.c.0.s8 %v22_v37 }
   0x4   :  { %v1029_v3 = vld [vmem:[%s1378_s1 + $0x80] sm:$0xff]   ;;  %912 = vmatpush3.bf16.msra.mxu0 %v1028_v2  ;;  %v1033_v7 = vld [vmem:[%s1378_s1 + $0x88] sm:$0xff]   ;;  %v1037_v11 = vld [vmem:[%s1378_s1 + $0x90] sm:$0xff]  }
   0x5   :  { %934 = vmatpush3.bf16.msra.mxu1 %v1029_v3  ;;  %913 = vmatprep.subr.bf16.mxu0 %v1030_v4  ;;  %v1038_v12 = vld [vmem:[%s1378_s1 + $0x58] sm:$0xff]   ;;  %v1042_v16 = vld [vmem:[%s1378_s1 + $0x60] sm:$0xff]   ;;  %v1046_v20 = vld [vmem:[%s1378_s1 + $0x68] sm:$0xff]   ;;  %v1249_v41 = vsub.s32 %v23_v39, %v1237_v33 }
   0x6   :  { %935 = vmatprep.subr.bf16.mxu1 %v1031_v5  ;;  %v1039_v13 = vld [vmem:[%s1378_s1 + $0xd8] sm:$0xff]   ;;  %v1043_v17 = vld [vmem:[%s1378_s1 + $0xe0] sm:$0xff]   ;;  %v1047_v21 = vld [vmem:[%s1378_s1 + $0xe8] sm:$0xff]  }
   0x7   :  { %v1040_v14 = vld [vmem:[%s1378_s1 + $0x18] sm:$0xff]   ;;  %v1044_v18 = vld [vmem:[%s1378_s1 + $0x20] sm:$0xff]   ;;  %v1048_v22 = vld [vmem:[%s1378_s1 + $0x28] sm:$0xff]  }
   0x8   :  { %914 = vmatpush3.bf16.msra.mxu0 %v1032_v6  ;;  %v1041_v15 = vld [vmem:[%s1378_s1 + $0x98] sm:$0xff]   ;;  %v1045_v19 = vld [vmem:[%s1378_s1 + $0xa0] sm:$0xff]   ;;  %v1049_v23 = vld [vmem:[%s1378_s1 + $0xa8] sm:$0xff]  }
   0x9   :  { %936 = vmatpush3.bf16.msra.mxu1 %v1033_v7  ;;  %915 = vmatprep.subr.bf16.mxu0 %v1034_v8  ;;  %v1050_v24 = vld [vmem:[%s1378_s1 + $0x70] sm:$0xff]   ;;  %v1054_v29 = vld [vmem:[%s1378_s1 + $0x78] sm:$0xff]   ;;  %v16_v34 = vld [vmem:[%s1377_s0] sm:$0xff] }
   0xa   :  { %937 = vmatprep.subr.bf16.mxu1 %v1035_v9  ;;  %v1051_v25 = vld [vmem:[%s1378_s1 + $0xf0] sm:$0xff]   ;;  %v1055_v30 = vld [vmem:[%s1378_s1 + $0xf8] sm:$0xff]   ;;  %v1059_v35 = vld [vmem:[%s1378_s1 + $0x140] sm:$0xff]   ;;  %v20_v40 = vcombine.high %v16_v34, %v16_v34  ;;  %v27_v42 = vrot.slane %v16_v34, %v1249_v41 }
   0xb   :  { %v1052_v26 = vld [vmem:[%s1378_s1 + $0x30] sm:$0xff]   ;;  %v1056_v31 = vld [vmem:[%s1378_s1 + $0x38] sm:$0xff]   ;;  %v1060_v38 = vld [vmem:[%s1378_s1 + $0x1c0] sm:$0xff]  }
   0xc   :  { %916 = vmatpush3.bf16.msra.mxu0 %v1036_v10  ;;  %v1053_v27 = vld [vmem:[%s1378_s1 + $0xb0] sm:$0xff]   ;;  %v1057_v32 = vld [vmem:[%s1378_s1 + $0xb8] sm:$0xff]   ;;  %v34_v43 = vrot.slane %v20_v40, %v1249_v41  ;;  %v35_v44 = vcombine.high %v27_v42, %v27_v42  ;;  %v1061_v46 = vld [vmem:[%s1378_s1 + $0x100] sm:$0xff]   ;;  %v62_v47 = vpack.c.bf16 %v27_v42, %v27_v42 }
   0xd   :  { %938 = vmatpush3.bf16.msra.mxu1 %v1037_v11  ;;  %917 = vmatprep.subr.bf16.mxu0 %v1038_v12  ;;  %v1062_v49 = vld [vmem:[%s1378_s1 + $0x180] sm:$0xff]   ;;  %v1063_v52 = vld [vmem:[%s1378_s1 + $0x148] sm:$0xff]   ;;  %v1067_v56 = vld [vmem:[%s1378_s1 + $0x150] sm:$0xff]  }
   0xe   :  { %939 = vmatprep.subr.bf16.mxu1 %v1039_v13  ;;  %v36_v45 = vcombine.high %v34_v43, %v34_v43  ;;  %v64_v48 = vpack.c.bf16 %v34_v43, %v34_v43  ;;  %v63_v50 = vpack.c.bf16 %v35_v44, %v35_v44  ;;  %v1064_v53 = vld [vmem:[%s1378_s1 + $0x1c8] sm:$0xff]   ;;  %v1068_v57 = vld [vmem:[%s1378_s1 + $0x1d0] sm:$0xff]   ;;  %v1071_v60 = vld [vmem:[%s1378_s1 + $0x158] sm:$0xff]  }
   0xf   :  { %v1065_v54 = vld [vmem:[%s1378_s1 + $0x108] sm:$0xff]   ;;  %v1069_v58 = vld [vmem:[%s1378_s1 + $0x110] sm:$0xff]   ;;  %v1072_v61 = vld [vmem:[%s1378_s1 + $0x1d8] sm:$0xff]  }
  0x10   :  { %918 = vmatpush3.bf16.msra.mxu0 %v1040_v14  ;;  %v65_v51 = vpack.c.bf16 %v36_v45, %v36_v45  ;;  %619 = vmatprep.mubr.bf16.mxu0 %v63_v50  ;;  %v1066_v55 = vld [vmem:[%s1378_s1 + $0x188] sm:$0xff]   ;;  %v1070_v59 = vld [vmem:[%s1378_s1 + $0x190] sm:$0xff]   ;;  %v1073_v62 = vld [vmem:[%s1378_s1 + $0x118] sm:$0xff]  }
  0x11   :  { %940 = vmatpush3.bf16.msra.mxu1 %v1041_v15  ;;  %919 = vmatprep.subr.bf16.mxu0 %v1042_v16  ;;  %v1074_v63 = vld [vmem:[%s1378_s1 + $0x198] sm:$0xff]   ;;  %v1075_v0 = vld [vmem:[%s1378_s1 + $0x160] sm:$0xff]   ;;  %v1079_v4 = vld [vmem:[%s1378_s1 + $0x168] sm:$0xff]  }
  0x12   :  { %941 = vmatprep.subr.bf16.mxu1 %v1043_v17  ;;  %659 = vmatprep.mubr.bf16.mxu1 %v65_v51  ;;  %v1076_v1 = vld [vmem:[%s1378_s1 + $0x1e0] sm:$0xff]   ;;  %v1080_v5 = vld [vmem:[%s1378_s1 + $0x1e8] sm:$0xff]   ;;  %v1083_v8 = vld [vmem:[%s1378_s1 + $0x170] sm:$0xff]  }
  0x13   :  { %v1077_v2 = vld [vmem:[%s1378_s1 + $0x120] sm:$0xff]   ;;  %v1081_v6 = vld [vmem:[%s1378_s1 + $0x128] sm:$0xff]   ;;  %v1084_v9 = vld [vmem:[%s1378_s1 + $0x1f0] sm:$0xff]  }
  0x14   :  { %920 = vmatpush3.bf16.msra.mxu0 %v1044_v18  ;;  %v1078_v3 = vld [vmem:[%s1378_s1 + $0x1a0] sm:$0xff]   ;;  %v1082_v7 = vld [vmem:[%s1378_s1 + $0x1a8] sm:$0xff]  }
  0x15   :  { %942 = vmatpush3.bf16.msra.mxu1 %v1045_v19  ;;  %921 = vmatprep.subr.bf16.mxu0 %v1046_v20  ;;  %v17_v10 = vld [vmem:[%s1377_s0 + $0x8] sm:$0xff] }
  0x16   :  { %943 = vmatprep.subr.bf16.mxu1 %v1047_v21 }
  0x18   :  { %922 = vmatpush3.bf16.msra.mxu0 %v1048_v22 }
  0x19   :  { %944 = vmatpush3.bf16.msra.mxu1 %v1049_v23  ;;  %923 = vmatprep.subr.bf16.mxu0 %v1050_v24 }
  0x1a   :  { %945 = vmatprep.subr.bf16.mxu1 %v1051_v25 }
  0x1c   :  { %924 = vmatpush3.bf16.msra.mxu0 %v1052_v26 }
  0x1d   :  { %946 = vmatpush3.bf16.msra.mxu1 %v1053_v27  ;;  %925 = vmatprep.subr.bf16.mxu0 %v1054_v29 }
  0x1e   :  { %947 = vmatprep.subr.bf16.mxu1 %v1055_v30 }
  0x20   :  { %926 = vmatpush3.bf16.msra.mxu0 %v1056_v31 }
  0x21   :  { %948 = vmatpush3.bf16.msra.mxu1 %v1057_v32  ;;  %955 = vmatprep.subr.bf16.mxu0 %v1059_v35 }
  0x22   :  { %977 = vmatprep.subr.bf16.mxu1 %v1060_v38 }
  0x23   :  { %620 = vmatmul.mubr.bf16.vlgmr.msra.gmra.mrb[0].mxu0 %v62_v47 }
  0x24   :  { %660 = vmatmul.mubr.bf16.vlgmr.msra.gmra.mrb[0].mxu1 %v64_v48  ;;  %956 = vmatpush3.bf16.msra.mxu0 %v1061_v46 }
  0x25   :  { %978 = vmatpush3.bf16.msra.mxu1 %v1062_v49  ;;  %957 = vmatprep.subr.bf16.mxu0 %v1063_v52 }
  0x26   :  { %979 = vmatprep.subr.bf16.mxu1 %v1064_v53 }
  0x28   :  { %958 = vmatpush3.bf16.msra.mxu0 %v1065_v54 }
  0x29   :  { %980 = vmatpush3.bf16.msra.mxu1 %v1066_v55  ;;  %959 = vmatprep.subr.bf16.mxu0 %v1067_v56 }
  0x2a   :  { %981 = vmatprep.subr.bf16.mxu1 %v1068_v57 }
  0x2c   :  { %960 = vmatpush3.bf16.msra.mxu0 %v1069_v58 }
  0x2d   :  { %982 = vmatpush3.bf16.msra.mxu1 %v1070_v59  ;;  %961 = vmatprep.subr.bf16.mxu0 %v1071_v60 }
  0x2e   :  { %983 = vmatprep.subr.bf16.mxu1 %v1072_v61 }
  0x30   :  { %962 = vmatpush3.bf16.msra.mxu0 %v1073_v62 }
  0x31   :  { %984 = vmatpush3.bf16.msra.mxu1 %v1074_v63  ;;  %963 = vmatprep.subr.bf16.mxu0 %v1075_v0 }
  0x32   :  { %985 = vmatprep.subr.bf16.mxu1 %v1076_v1 }
  0x34   :  { %964 = vmatpush3.bf16.msra.mxu0 %v1077_v2 }
  0x35   :  { %986 = vmatpush3.bf16.msra.mxu1 %v1078_v3  ;;  %965 = vmatprep.subr.bf16.mxu0 %v1079_v4 }
  0x36   :  { %987 = vmatprep.subr.bf16.mxu1 %v1080_v5 }
  0x37   :  { %8 = vsyncpa [#allocation3], 0  ;;  %v44_v11 = vrot.slane %v17_v10, %v1249_v41  ;;  %v37_v12 = vcombine.high %v17_v10, %v17_v10  ;;  %v1085_v13 = vld [vmem:[%s1378_s1 + $0x130] sm:$0xff]   ;;  %v1087_v17 = vld [vmem:[%s1378_s1 + $0x178] sm:$0xff]   ;;  %v1117_v29 = vmov 0.0|0.0   ;;  %vm1118_vm0 = vmmov 0  }
  0x38   :  { %966 = vmatpush3.bf16.msra.mxu0 %v1081_v6  ;;  %v1086_v14 = vld [vmem:[%s1378_s1 + $0x1b0] sm:$0xff]   ;;  %v1088_v18 = vld [vmem:[%s1378_s1 + $0x1f8] sm:$0xff]   ;;  %v748_v26 = vld [vmem:[%s1379_s2] sm:$0xff]  ;;  %v1119_v34 = vmov 0.0   ;;  %v201_v35 = vsub.s32 0, %v1237_v33  ;;  %vm756_vm1 = vcmask 261120  }
  0x39   :  { %988 = vmatpush3.bf16.msra.mxu1 %v1082_v7  ;;  %v52_v15 = vcombine.high %v44_v11, %v44_v11  ;;  %v51_v16 = vrot.slane %v37_v12, %v1249_v41  ;;  %967 = vmatprep.subr.bf16.mxu0 %v1083_v8  ;;  %v1089_v21 = vld [vmem:[%s1378_s1 + $0x138] sm:$0xff]   ;;  %v66_v24 = vpack.c.bf16 %v44_v11, %v44_v11  ;;  %v749_v27 = vld [vmem:[%s1379_s2 + $0x8] sm:$0xff]  ;;  %v750_v30 = vld [vmem:[%s1379_s2 + $0x10] sm:$0xff]  ;;  %v754_v63 = vsub.s32 1, %v1237_v33 }
  0x3a   :  { %989 = vmatprep.subr.bf16.mxu1 %v1084_v9  ;;  %v1090_v22 = vld [vmem:[%s1378_s1 + $0x1b8] sm:$0xff]   ;;  %v1016_v28 = vpack.c.bf16 %v749_v27, %v748_v26  ;;  %v198_v36 = vld [vmem:[%s1379_s2 + $0x20] sm:$0xff] }
  0x3b   :  { %v67_v19 = vpack.c.bf16 %v52_v15, %v52_v15  ;;  %v53_v20 = vcombine.high %v51_v16, %v51_v16  ;;  %v68_v25 = vpack.c.bf16 %v51_v16, %v51_v16  ;;  %v751_v31 = vld [vmem:[%s1379_s2 + $0x18] sm:$0xff]  ;;  %v202_v39 = vrot.slane %v198_v36, %v201_v35  ;;  %s1120_s2 = smov [#allocation2]  }
  0x3c   :  { %968 = vmatpush3.bf16.msra.mxu0 %v1085_v13  ;;  %v1019_v32 = vpack.c.bf16 %v751_v31, %v750_v30  ;;  %v755_v0 = vrot.slane %v198_v36, %v754_v63  ;;  %s838_s17 = sshll.u32 %s1120_s2, 4  ;;  %s839_s17 = int_to_ptr.vmem [resolvable:$true] %s838_s17 }
  0x3d   :  { %990 = vmatpush3.bf16.msra.mxu1 %v1086_v14  ;;  %v69_v23 = vpack.c.bf16 %v53_v20, %v53_v20  ;;  %969 = vmatprep.subr.bf16.mxu0 %v1087_v17  ;;  %s1092_s18 = scalar_lea.vmem %s839_s17, 16  ;;  %s1096_s19 = scalar_lea.vmem %s839_s17, 32 }
  0x3e   :  { %991 = vmatprep.subr.bf16.mxu1 %v1088_v18  ;;  %699 = vmatprep.mubr.bf16.mxu0 %v67_v19  ;;  %p1093_p0 = scmp.ne.s32.totalorder %s839_s17, %s1092_s18  ;;  %p1097_p1 = scmp.lt.s32.totalorder %s839_s17, %s839_s17 }
  0x3f   :  { %739 = vmatprep.mubr.bf16.mxu1 %v69_v23  ;;  %p1098_p2 = scmp.lt.s32.totalorder %s1096_s19, %s1092_s18 }
  0x40   :  { %970 = vmatpush3.bf16.msra.mxu0 %v1089_v21 }
  0x41   :  { %992 = vmatpush3.bf16.msra.mxu1 %v1090_v22  ;;  %1015 = vmatprep.subr.bf16.mxu0 %v1117_v29  ;;  %p1099_p3 = por %p1098_p2, %p1097_p1 }
  0x43   :  { %700 = vmatmul.mubr.bf16.vlgmr.msra.gmra.mrb[4].mxu0 %v66_v24  ;;  %p1100_p4 = pnand %p1099_p3, %p1093_p0 }
  0x44   :  { %740 = vmatmul.mubr.bf16.vlgmr.msra.gmra.mrb[4].mxu1 %v68_v25  ;;  %1017 = vmatpush3.bf16.msra.mxu0 %v1016_v28 }
  0x45   :  { %1018 = vmatprep.subr.bf16.mxu0 %v1117_v29  ;;  %1012 = vmatprep.mubr.msk.f32.mxu0 %vm1118_vm0, %v1119_v34 }
  0x48   :  { %1020 = vmatpush3.bf16.msra.mxu0 %v1019_v32 }
  0xf6   :  { %v927_v37 = vpop.f32.mrb[0].mxu0 }
  0xf7   :  { %v949_v38 = vpop.f32.mrb[0].mxu1  ;;  %v928_v40 = vpop.f32.mrb[1].mxu0 }
  0xf8   :  { %v950_v41 = vpop.f32.mrb[1].mxu1  ;;  %v929_v42 = vadd.f32 %v928_v40, %v927_v37  ;;  %v930_v44 = vpop.f32.mrb[2].mxu0 }
  0xf9   :  { %v951_v43 = vadd.f32 %v950_v41, %v949_v38  ;;  %v952_v45 = vpop.f32.mrb[2].mxu1  ;;  %v931_v46 = vpop.f32.mrb[3].mxu0 }
  0xfa   :  { %v953_v47 = vpop.f32.mrb[3].mxu1  ;;  %v622_v48 = vadd.f32 %v929_v42, %v202_v39 }
  0xfc   :  { %v662_v49 = vadd.f32 %v951_v43, %v622_v48 }
 0x116   :  { %v971_v50 = vpop.f32.mrb[4].mxu0 }
 0x117   :  { %v993_v51 = vpop.f32.mrb[4].mxu1  ;;  %v972_v52 = vpop.f32.mrb[5].mxu0 }
 0x118   :  { %v994_v53 = vpop.f32.mrb[5].mxu1  ;;  %v973_v54 = vadd.f32 %v972_v52, %v971_v50  ;;  %v974_v56 = vpop.f32.mrb[6].mxu0 }
 0x119   :  { %v995_v55 = vadd.f32 %v994_v53, %v993_v51  ;;  %v996_v57 = vpop.f32.mrb[6].mxu1  ;;  %v975_v58 = vpop.f32.mrb[7].mxu0 }
 0x11a   :  { %v997_v59 = vpop.f32.mrb[7].mxu1  ;;  %v702_v60 = vadd.f32 %v973_v54, %v662_v49 }
 0x11c   :  { %v742_v61 = vadd.f32 %v995_v55, %v702_v60 }
 0x11e   :  { %v747_v62 = vmax.f32 %v742_v61, 0.0 }
 0x120   :  { %1013 = vmatmul.mubr.msk.f32.vlgmr.msra.gmra.mrb[8].mxu0 %vm756_vm1, %v747_v62 }
 0x1f3   :  { %v826_v1 = vpop.f32.mrb[8].mxu0 }
 0x1f4   :  { %v827_v2 = vadd.f32 %v826_v1, %v755_v0  ;;  %v1014_v3 = vpop.f32.mrb[9].mxu0 }
 0x1f6   :  { %v830_v4 = vpack.c.bf16 %v827_v2, %v827_v2 }
 0x1f8   :  { %831 = vst [vmem:[#allocation2] sm:$0x1] %v830_v4 }
 0x1f9   :  { %1103 = shalt.err (!%p1100_p4)
}
 0x1fa   :  { %s1104_s22 = scalar_lea.hbm %s1380_s3, 16 }
 0x1fb   :  { %p1105_p5 = scmp.ne.s32.totalorder %s1380_s3, %s1104_s22  ;;  %p1108_p6 = scmp.lt.u32.totalorder %s1104_s22, %s1380_s3 }
 0x1fd   :  { %p1110_p7 = pnand %p1108_p6, %p1105_p5 }
 0x1ff   :  { %1113 = shalt.err (!%p1110_p7)
}
 0x200   :  { %841 = dma.vmem_to_hbm [thread:$0]  %s839_s17, 16, %s1380_s3, [#allocation3]  }
 0x201   :  { %1114 = dma.done.wait [#allocation3], 16  }
 0x202   :  { %1115 = vsyncadd [#allocation3], 4294967280 }
 0x203   :  { %845 = vsyncpa [#allocation3], 1 }

</bundles_post_ra>
